<compile_context>
chip_gen: v7x
topology: tpu7x:2x2x1
jax: 0.10.0
libtpu: 0.0.40
codegen_flags: <defaults>
</compile_context>

<pallas_src>
import functools
import math

import jax
import jax.numpy as jnp
from jax.experimental import pallas as pl
from jax.experimental.pallas import tpu as pltpu

BN_EPS = 1e-5        # nn.BatchNorm1d default eps
NUM_BLOCKS = 4       # layer1..layer4, one Residual block each
PAD = 128            # lane-dense feature padding


def _round_up(n, m):
    return ((n + m - 1) // m) * m


# ----------------------------------------------------------------------------
# Fused kernel: pre -> 4 residual blocks -> out, all VMEM-resident.
# Weights live in one (R, 128) blob, biases in one (11, 128) blob.
# ----------------------------------------------------------------------------
def _make_kernel(in_rows):
    o2 = in_rows                      # fc2 slab offset
    o3 = in_rows + PAD                # fc3[0] slab offset
    o4 = o3 + NUM_BLOCKS * PAD        # fc4[0] slab offset
    o5 = o4 + NUM_BLOCKS * PAD        # fc5 slab offset
    nb = NUM_BLOCKS

    def kernel(x_ref, w_ref, b_ref, o_ref):
        x = x_ref[...]                                                   # (B, in_rows)

        # pre: fc1(+BN folded) -> ReLU -> fc2(+BN folded) -> ReLU
        h = jnp.dot(x, w_ref[0:in_rows, :],
                    preferred_element_type=jnp.float32) + b_ref[0:1, :]
        h = jnp.maximum(h, 0.0)                                          # (B, 128)
        h = jnp.dot(h, w_ref[o2:o2 + PAD, :],
                    preferred_element_type=jnp.float32) + b_ref[1:2, :]
        h = jnp.maximum(h, 0.0)                                          # (B, 128)

        # layer1..4: Residual(H,H) blocks, identity shortcut, unrolled
        for i in range(nb):
            r = jnp.dot(h, w_ref[o3 + i * PAD:o3 + (i + 1) * PAD, :],
                        preferred_element_type=jnp.float32) + b_ref[2 + i:3 + i, :]
            r = jnp.maximum(r, 0.0)                                      # fc3+BN, ReLU
            r = jnp.dot(r, w_ref[o4 + i * PAD:o4 + (i + 1) * PAD, :],
                        preferred_element_type=jnp.float32) + b_ref[2 + nb + i:3 + nb + i, :]
            h = jnp.maximum(r + h, 0.0)                                  # +identity, ReLU

        # out: fc5 (dropout p=0 is identity); lane-dense (B, 128) store
        o_ref[...] = (jnp.dot(h, w_ref[o5:o5 + PAD, :],
                              preferred_element_type=jnp.float32)
                      + b_ref[2 + 2 * nb:3 + 2 * nb, :])

    return kernel


# ----------------------------------------------------------------------------
# Host-side ONE-TIME packing: fold inference BN into the preceding Linear,
# zero-pad every feature dim to 128 lanes, concat into two blobs.
# ----------------------------------------------------------------------------
def _fold_bn(w_t, b, gamma, beta, mean, var):
    # BN(z) = (z - mean)/sqrt(var+eps)*gamma + beta,  z = x @ w_t + b  (exact fold)
    s = gamma / jnp.sqrt(var + BN_EPS)
    return w_t * s[None, :], b * s + (beta - mean * s)


def _pad2(a, rows, cols):
    return jnp.pad(a, ((0, rows - a.shape[0]), (0, cols - a.shape[1])))


def _pad1(a, cols):
    return jnp.pad(a, ((0, cols - a.shape[0]),))


def pack_params(params):
    """Call ONCE outside the jitted forward; returns (wblob, bblob)."""
    input_size = params["fc1_w_t"].shape[0]
    in_rows = _round_up(input_size, 8)

    w1, b1 = _fold_bn(params["fc1_w_t"], params["fc1_b"], *params["bn1"])
    w2, b2 = _fold_bn(params["fc2_w_t"], params["fc2_b"], *params["bn2"])

    w_slabs = [_pad2(w1, in_rows, PAD), _pad2(w2, PAD, PAD)]
    b_rows = [_pad1(b1, PAD), _pad1(b2, PAD)]

    w3s, w4s, b3s, b4s = [], [], [], []
    for blk in params["blocks"]:
        w3, b3 = _fold_bn(blk["fc3_w_t"], blk["fc3_b"], *blk["bn3"])
        w4, b4 = _fold_bn(blk["fc4_w_t"], blk["fc4_b"], *blk["bn4"])
        w3s.append(_pad2(w3, PAD, PAD)); b3s.append(_pad1(b3, PAD))
        w4s.append(_pad2(w4, PAD, PAD)); b4s.append(_pad1(b4, PAD))

    w_slabs += w3s + w4s + [_pad2(params["fc5_w_t"], PAD, PAD)]
    b_rows += b3s + b4s + [_pad1(params["fc5_b"], PAD)]

    wblob = jnp.concatenate(w_slabs, axis=0)      # (in_rows + 10*128, 128) f32
    bblob = jnp.stack(b_rows, axis=0)             # (11, 128) f32
    return jax.device_put(wblob), jax.device_put(bblob)


# ----------------------------------------------------------------------------
# Jitted forward: exactly one pallas_call per step.
# ----------------------------------------------------------------------------
@functools.partial(jax.jit, static_argnames=("output_size",))
def forward(x, wblob, bblob, output_size):
    B, in_feat = x.shape
    in_rows = _round_up(in_feat, 8)
    if in_rows != in_feat:                        # static (Python-level) decision
        x = jnp.pad(x, ((0, 0), (0, in_rows - in_feat)))

    flops = 2 * B * (in_rows * PAD + (2 + 2 * NUM_BLOCKS) * PAD * PAD)
    bytes_accessed = 4 * (x.size + wblob.size + bblob.size + B * PAD)

    y = pl.pallas_call(
        _make_kernel(in_rows),
        out_shape=jax.ShapeDtypeStruct((B, PAD), jnp.float32),
        in_specs=[pl.BlockSpec(memory_space=pltpu.MemorySpace.VMEM)] * 3,
        out_specs=pl.BlockSpec(memory_space=pltpu.MemorySpace.VMEM),
        cost_estimate=pl.CostEstimate(flops=flops, transcendentals=0,
                                      bytes_accessed=bytes_accessed),
    )(x, wblob, bblob)
    return y[:, :output_size]                     # drop lane padding


# ----------------------------------------------------------------------------
# Deterministic parameter init.
#   Linear: kaiming-normal weights (stored pre-transposed as (in, out)), zero bias.
#   BN: non-trivial gamma/beta/running stats so the BN math is exercised.
# ----------------------------------------------------------------------------
def init_params(key, input_size, embedding_size, hidden_size, output_size):
    keys = iter(jax.random.split(key, 64))

    def kaiming(shape_in_out):
        fan_in = shape_in_out[0]
        return (jax.random.normal(next(keys), shape_in_out, jnp.float32)
                * math.sqrt(2.0 / fan_in))

    def bn(n):
        gamma = 1.0 + 0.1 * jax.random.normal(next(keys), (n,), jnp.float32)
        beta = 0.1 * jax.random.normal(next(keys), (n,), jnp.float32)
        mean = 0.1 * jax.random.normal(next(keys), (n,), jnp.float32)
        var = 1.0 + 0.2 * jax.random.uniform(next(keys), (n,), jnp.float32)
        return (gamma, beta, mean, var)

    params = {
        "fc1_w_t": kaiming((input_size, embedding_size)),
        "fc1_b": jnp.zeros((embedding_size,), jnp.float32),
        "bn1": bn(embedding_size),
        "fc2_w_t": kaiming((embedding_size, hidden_size)),
        "fc2_b": jnp.zeros((hidden_size,), jnp.float32),
        "bn2": bn(hidden_size),
        "fc5_w_t": kaiming((hidden_size, output_size)),
        "fc5_b": jnp.zeros((output_size,), jnp.float32),
        "blocks": [],
    }
    for _ in range(NUM_BLOCKS):
        params["blocks"].append({
            "fc3_w_t": kaiming((hidden_size, hidden_size)),
            "fc3_b": jnp.zeros((hidden_size,), jnp.float32),
            "bn3": bn(hidden_size),
            "fc4_w_t": kaiming((hidden_size, hidden_size)),
            "fc4_b": jnp.zeros((hidden_size,), jnp.float32),
            "bn4": bn(hidden_size),
        })
    return params


# ----------------------------------------------------------------------------
# Pure-JAX reference (explicit, unfolded BatchNorm) for the correctness check.
# ----------------------------------------------------------------------------
def _bn_apply(z, gamma, beta, mean, var):
    return (z - mean) / jnp.sqrt(var + BN_EPS) * gamma + beta


def reference_forward(x, params):
    h = x @ params["fc1_w_t"] + params["fc1_b"]
    h = jnp.maximum(_bn_apply(h, *params["bn1"]), 0.0)
    h = h @ params["fc2_w_t"] + params["fc2_b"]
    h = jnp.maximum(_bn_apply(h, *params["bn2"]), 0.0)
    for blk in params["blocks"]:
        r = h @ blk["fc3_w_t"] + blk["fc3_b"]
        r = jnp.maximum(_bn_apply(r, *blk["bn3"]), 0.0)
        r = r @ blk["fc4_w_t"] + blk["fc4_b"]
        r = _bn_apply(r, *blk["bn4"])
        h = jnp.maximum(r + h, 0.0)
    return h @ params["fc5_w_t"] + params["fc5_b"]


# ----------------------------------------------------------------------------
if __name__ == "__main__":
    key = jax.random.PRNGKey(0)
    kp, kx = jax.random.split(key)

    B = 8
    input_size = 24
    embedding_size = 100     # module default
    hidden_size = 20         # module default
    output_size = 1          # module default

    params = init_params(kp, input_size, embedding_size, hidden_size, output_size)
    x = jax.random.normal(kx, (B, input_size), jnp.float32)

    # One-time host-side packing (BN fold + lane padding + blob concat).
    wblob, bblob = pack_params(params)
    jax.block_until_ready((wblob, bblob))

    out = jax.block_until_ready(forward(x, wblob, bblob, output_size=output_size))
    assert out.shape == (B, output_size)

    ref = reference_forward(x, params)
    err = float(jnp.max(jnp.abs(out - ref)))
    if err > 2e-3:
        raise SystemExit(f"Pallas/reference mismatch: max abs err {err}")

    print("KERNEL_OK")
</pallas_src>

<mosaic_0001>
module attributes {stable_mosaic.version = 11 : i64} {
  func.func @kernel(%arg0: memref<8x24xf32, #tpu.memory_space<vmem>>, %arg1: memref<1304x128xf32, #tpu.memory_space<vmem>>, %arg2: memref<11x128xf32, #tpu.memory_space<vmem>>, %arg3: memref<8x128xf32, #tpu.memory_space<vmem>>) attributes {dimension_semantics = [], scalar_prefetch = 0 : i64, scratch_operands = 0 : i64, tpu.core_type = #tpu.core_type<tc>} {
    %c0 = arith.constant 0 : index
    %c0_0 = arith.constant 0 : index
    %0 = vector.load %arg0[%c0, %c0_0] : memref<8x24xf32, #tpu.memory_space<vmem>>, vector<8x24xf32>
    %c0_1 = arith.constant 0 : index
    %c0_2 = arith.constant 0 : index
    %1 = vector.load %arg1[%c0_1, %c0_2] : memref<1304x128xf32, #tpu.memory_space<vmem>>, vector<24x128xf32>
    %cst = arith.constant dense<0.000000e+00> : vector<8x128xf32>
    %2 = tpu.matmul %0, %1, %cst {dimension_numbers = #tpu.dot_dimension_numbers<[1], [0], [0], [1], [0, 0, 1, 1], [], []>} : vector<8x24xf32>, vector<24x128xf32>, vector<8x128xf32> -> vector<8x128xf32>
    %c0_3 = arith.constant 0 : index
    %c0_4 = arith.constant 0 : index
    %3 = vector.load %arg2[%c0_3, %c0_4] : memref<11x128xf32, #tpu.memory_space<vmem>>, vector<1x128xf32>
    %4 = vector.broadcast %3 : vector<1x128xf32> to vector<8x128xf32>
    %5 = arith.addf %2, %4 : vector<8x128xf32>
    %cst_5 = arith.constant 0.000000e+00 : f32
    %6 = vector.broadcast %cst_5 : f32 to vector<8x128xf32>
    %7 = arith.maximumf %5, %6 : vector<8x128xf32>
    %c24 = arith.constant 24 : index
    %c0_6 = arith.constant 0 : index
    %8 = vector.load %arg1[%c24, %c0_6] : memref<1304x128xf32, #tpu.memory_space<vmem>>, vector<128x128xf32>
    %cst_7 = arith.constant dense<0.000000e+00> : vector<8x128xf32>
    %9 = tpu.matmul %7, %8, %cst_7 {dimension_numbers = #tpu.dot_dimension_numbers<[1], [0], [0], [1], [0, 0, 1, 1], [], []>} : vector<8x128xf32>, vector<128x128xf32>, vector<8x128xf32> -> vector<8x128xf32>
    %c1 = arith.constant 1 : index
    %c0_8 = arith.constant 0 : index
    %10 = vector.load %arg2[%c1, %c0_8] : memref<11x128xf32, #tpu.memory_space<vmem>>, vector<1x128xf32>
    %11 = vector.broadcast %10 : vector<1x128xf32> to vector<8x128xf32>
    %12 = arith.addf %9, %11 : vector<8x128xf32>
    %cst_9 = arith.constant 0.000000e+00 : f32
    %13 = vector.broadcast %cst_9 : f32 to vector<8x128xf32>
    %14 = arith.maximumf %12, %13 : vector<8x128xf32>
    %c152 = arith.constant 152 : index
    %c0_10 = arith.constant 0 : index
    %15 = vector.load %arg1[%c152, %c0_10] : memref<1304x128xf32, #tpu.memory_space<vmem>>, vector<128x128xf32>
    %cst_11 = arith.constant dense<0.000000e+00> : vector<8x128xf32>
    %16 = tpu.matmul %14, %15, %cst_11 {dimension_numbers = #tpu.dot_dimension_numbers<[1], [0], [0], [1], [0, 0, 1, 1], [], []>} : vector<8x128xf32>, vector<128x128xf32>, vector<8x128xf32> -> vector<8x128xf32>
    %c2 = arith.constant 2 : index
    %c0_12 = arith.constant 0 : index
    %17 = vector.load %arg2[%c2, %c0_12] : memref<11x128xf32, #tpu.memory_space<vmem>>, vector<1x128xf32>
    %18 = vector.broadcast %17 : vector<1x128xf32> to vector<8x128xf32>
    %19 = arith.addf %16, %18 : vector<8x128xf32>
    %cst_13 = arith.constant 0.000000e+00 : f32
    %20 = vector.broadcast %cst_13 : f32 to vector<8x128xf32>
    %21 = arith.maximumf %19, %20 : vector<8x128xf32>
    %c664 = arith.constant 664 : index
    %c0_14 = arith.constant 0 : index
    %22 = vector.load %arg1[%c664, %c0_14] : memref<1304x128xf32, #tpu.memory_space<vmem>>, vector<128x128xf32>
    %cst_15 = arith.constant dense<0.000000e+00> : vector<8x128xf32>
    %23 = tpu.matmul %21, %22, %cst_15 {dimension_numbers = #tpu.dot_dimension_numbers<[1], [0], [0], [1], [0, 0, 1, 1], [], []>} : vector<8x128xf32>, vector<128x128xf32>, vector<8x128xf32> -> vector<8x128xf32>
    %c6 = arith.constant 6 : index
    %c0_16 = arith.constant 0 : index
    %24 = vector.load %arg2[%c6, %c0_16] : memref<11x128xf32, #tpu.memory_space<vmem>>, vector<1x128xf32>
    %25 = vector.broadcast %24 : vector<1x128xf32> to vector<8x128xf32>
    %26 = arith.addf %23, %25 : vector<8x128xf32>
    %27 = arith.addf %26, %14 : vector<8x128xf32>
    %cst_17 = arith.constant 0.000000e+00 : f32
    %28 = vector.broadcast %cst_17 : f32 to vector<8x128xf32>
    %29 = arith.maximumf %27, %28 : vector<8x128xf32>
    %c280 = arith.constant 280 : index
    %c0_18 = arith.constant 0 : index
    %30 = vector.load %arg1[%c280, %c0_18] : memref<1304x128xf32, #tpu.memory_space<vmem>>, vector<128x128xf32>
    %cst_19 = arith.constant dense<0.000000e+00> : vector<8x128xf32>
    %31 = tpu.matmul %29, %30, %cst_19 {dimension_numbers = #tpu.dot_dimension_numbers<[1], [0], [0], [1], [0, 0, 1, 1], [], []>} : vector<8x128xf32>, vector<128x128xf32>, vector<8x128xf32> -> vector<8x128xf32>
    %c3 = arith.constant 3 : index
    %c0_20 = arith.constant 0 : index
    %32 = vector.load %arg2[%c3, %c0_20] : memref<11x128xf32, #tpu.memory_space<vmem>>, vector<1x128xf32>
    %33 = vector.broadcast %32 : vector<1x128xf32> to vector<8x128xf32>
    %34 = arith.addf %31, %33 : vector<8x128xf32>
    %cst_21 = arith.constant 0.000000e+00 : f32
    %35 = vector.broadcast %cst_21 : f32 to vector<8x128xf32>
    %36 = arith.maximumf %34, %35 : vector<8x128xf32>
    %c792 = arith.constant 792 : index
    %c0_22 = arith.constant 0 : index
    %37 = vector.load %arg1[%c792, %c0_22] : memref<1304x128xf32, #tpu.memory_space<vmem>>, vector<128x128xf32>
    %cst_23 = arith.constant dense<0.000000e+00> : vector<8x128xf32>
    %38 = tpu.matmul %36, %37, %cst_23 {dimension_numbers = #tpu.dot_dimension_numbers<[1], [0], [0], [1], [0, 0, 1, 1], [], []>} : vector<8x128xf32>, vector<128x128xf32>, vector<8x128xf32> -> vector<8x128xf32>
    %c7 = arith.constant 7 : index
    %c0_24 = arith.constant 0 : index
    %39 = vector.load %arg2[%c7, %c0_24] : memref<11x128xf32, #tpu.memory_space<vmem>>, vector<1x128xf32>
    %40 = vector.broadcast %39 : vector<1x128xf32> to vector<8x128xf32>
    %41 = arith.addf %38, %40 : vector<8x128xf32>
    %42 = arith.addf %41, %29 : vector<8x128xf32>
    %cst_25 = arith.constant 0.000000e+00 : f32
    %43 = vector.broadcast %cst_25 : f32 to vector<8x128xf32>
    %44 = arith.maximumf %42, %43 : vector<8x128xf32>
    %c408 = arith.constant 408 : index
    %c0_26 = arith.constant 0 : index
    %45 = vector.load %arg1[%c408, %c0_26] : memref<1304x128xf32, #tpu.memory_space<vmem>>, vector<128x128xf32>
    %cst_27 = arith.constant dense<0.000000e+00> : vector<8x128xf32>
    %46 = tpu.matmul %44, %45, %cst_27 {dimension_numbers = #tpu.dot_dimension_numbers<[1], [0], [0], [1], [0, 0, 1, 1], [], []>} : vector<8x128xf32>, vector<128x128xf32>, vector<8x128xf32> -> vector<8x128xf32>
    %c4 = arith.constant 4 : index
    %c0_28 = arith.constant 0 : index
    %47 = vector.load %arg2[%c4, %c0_28] : memref<11x128xf32, #tpu.memory_space<vmem>>, vector<1x128xf32>
    %48 = vector.broadcast %47 : vector<1x128xf32> to vector<8x128xf32>
    %49 = arith.addf %46, %48 : vector<8x128xf32>
    %cst_29 = arith.constant 0.000000e+00 : f32
    %50 = vector.broadcast %cst_29 : f32 to vector<8x128xf32>
    %51 = arith.maximumf %49, %50 : vector<8x128xf32>
    %c920 = arith.constant 920 : index
    %c0_30 = arith.constant 0 : index
    %52 = vector.load %arg1[%c920, %c0_30] : memref<1304x128xf32, #tpu.memory_space<vmem>>, vector<128x128xf32>
    %cst_31 = arith.constant dense<0.000000e+00> : vector<8x128xf32>
    %53 = tpu.matmul %51, %52, %cst_31 {dimension_numbers = #tpu.dot_dimension_numbers<[1], [0], [0], [1], [0, 0, 1, 1], [], []>} : vector<8x128xf32>, vector<128x128xf32>, vector<8x128xf32> -> vector<8x128xf32>
    %c8 = arith.constant 8 : index
    %c0_32 = arith.constant 0 : index
    %54 = vector.load %arg2[%c8, %c0_32] : memref<11x128xf32, #tpu.memory_space<vmem>>, vector<1x128xf32>
    %55 = vector.broadcast %54 : vector<1x128xf32> to vector<8x128xf32>
    %56 = arith.addf %53, %55 : vector<8x128xf32>
    %57 = arith.addf %56, %44 : vector<8x128xf32>
    %cst_33 = arith.constant 0.000000e+00 : f32
    %58 = vector.broadcast %cst_33 : f32 to vector<8x128xf32>
    %59 = arith.maximumf %57, %58 : vector<8x128xf32>
    %c536 = arith.constant 536 : index
    %c0_34 = arith.constant 0 : index
    %60 = vector.load %arg1[%c536, %c0_34] : memref<1304x128xf32, #tpu.memory_space<vmem>>, vector<128x128xf32>
    %cst_35 = arith.constant dense<0.000000e+00> : vector<8x128xf32>
    %61 = tpu.matmul %59, %60, %cst_35 {dimension_numbers = #tpu.dot_dimension_numbers<[1], [0], [0], [1], [0, 0, 1, 1], [], []>} : vector<8x128xf32>, vector<128x128xf32>, vector<8x128xf32> -> vector<8x128xf32>
    %c5 = arith.constant 5 : index
    %c0_36 = arith.constant 0 : index
    %62 = vector.load %arg2[%c5, %c0_36] : memref<11x128xf32, #tpu.memory_space<vmem>>, vector<1x128xf32>
    %63 = vector.broadcast %62 : vector<1x128xf32> to vector<8x128xf32>
    %64 = arith.addf %61, %63 : vector<8x128xf32>
    %cst_37 = arith.constant 0.000000e+00 : f32
    %65 = vector.broadcast %cst_37 : f32 to vector<8x128xf32>
    %66 = arith.maximumf %64, %65 : vector<8x128xf32>
    %c1048 = arith.constant 1048 : index
    %c0_38 = arith.constant 0 : index
    %67 = vector.load %arg1[%c1048, %c0_38] : memref<1304x128xf32, #tpu.memory_space<vmem>>, vector<128x128xf32>
    %cst_39 = arith.constant dense<0.000000e+00> : vector<8x128xf32>
    %68 = tpu.matmul %66, %67, %cst_39 {dimension_numbers = #tpu.dot_dimension_numbers<[1], [0], [0], [1], [0, 0, 1, 1], [], []>} : vector<8x128xf32>, vector<128x128xf32>, vector<8x128xf32> -> vector<8x128xf32>
    %c9 = arith.constant 9 : index
    %c0_40 = arith.constant 0 : index
    %69 = vector.load %arg2[%c9, %c0_40] : memref<11x128xf32, #tpu.memory_space<vmem>>, vector<1x128xf32>
    %70 = vector.broadcast %69 : vector<1x128xf32> to vector<8x128xf32>
    %71 = arith.addf %68, %70 : vector<8x128xf32>
    %72 = arith.addf %71, %59 : vector<8x128xf32>
    %cst_41 = arith.constant 0.000000e+00 : f32
    %73 = vector.broadcast %cst_41 : f32 to vector<8x128xf32>
    %74 = arith.maximumf %72, %73 : vector<8x128xf32>
    %c1176 = arith.constant 1176 : index
    %c0_42 = arith.constant 0 : index
    %75 = vector.load %arg1[%c1176, %c0_42] : memref<1304x128xf32, #tpu.memory_space<vmem>>, vector<128x128xf32>
    %cst_43 = arith.constant dense<0.000000e+00> : vector<8x128xf32>
    %76 = tpu.matmul %74, %75, %cst_43 {dimension_numbers = #tpu.dot_dimension_numbers<[1], [0], [0], [1], [0, 0, 1, 1], [], []>} : vector<8x128xf32>, vector<128x128xf32>, vector<8x128xf32> -> vector<8x128xf32>
    %c10 = arith.constant 10 : index
    %c0_44 = arith.constant 0 : index
    %77 = vector.load %arg2[%c10, %c0_44] : memref<11x128xf32, #tpu.memory_space<vmem>>, vector<1x128xf32>
    %78 = vector.broadcast %77 : vector<1x128xf32> to vector<8x128xf32>
    %79 = arith.addf %76, %78 : vector<8x128xf32>
    %c0_45 = arith.constant 0 : index
    %c0_46 = arith.constant 0 : index
    %80 = vector.load %arg3[%c0_45, %c0_46] : memref<8x128xf32, #tpu.memory_space<vmem>>, vector<8x128xf32>
    tpu.vector_store %arg3[%c0_45, %c0_46], %79 {strides = array<i32>} : memref<8x128xf32, #tpu.memory_space<vmem>>, vector<8x128xf32>,
    return
  }
}

</mosaic_0001>

<bundles_post_ra>
// kernel: forward.1
= control target key start
LH: loop header
LB: loop body
LE: loop exit
PB: predicated region body
PF: predicated region fallthrough
CT: control target
= control target key end

     0   :  { %8 = vsyncpa [#allocation3], 0  ;;  %s2131_s0 = inlined_call_operand.hbm [shape: f32[8,24], index: 0, kind: input, shape index: {}]   ;;  %s2132_s1 = inlined_call_operand.hbm [shape: f32[1304,128], index: 1, kind: input, shape index: {}]   ;;  %s2133_s2 = inlined_call_operand.hbm [shape: f32[11,128], index: 2, kind: input, shape index: {}]   ;;  %s2134_s3 = inlined_call_operand.vmem [shape: f32[8,128], index: 3, kind: output, shape index: {}]  }
   0x1   :  { %9 = vsyncpa [#allocation5], 0  ;;  %s1933_s12 = smov [#allocation4]   ;;  %s1863_s16 = scalar_lea.hbm %s2132_s1, 20864 }
   0x2   :  { %s25_s13 = sshll.u32 %s1933_s12, 4  ;;  %p1864_p0 = scmp.ne.s32.totalorder %s2132_s1, %s1863_s16  ;;  %s26_s13 = int_to_ptr.vmem [resolvable:$true] %s25_s13 }
   0x3   :  { %p1867_p1 = scmp.lt.u32.totalorder %s1863_s16, %s2132_s1 }
   0x5   :  { %p1869_p2 = pnand %p1867_p1, %p1864_p0 }
   0x7   :  { %1872 = shalt.err (!%p1869_p2)
}
   0x8   :  { %s1873_s21 = scalar_lea.vmem %s26_s13, 20864  ;;  %p1878_p4 = scmp.lt.s32.totalorder %s26_s13, %s26_s13 }
   0x9   :  { %p1874_p3 = scmp.ne.s32.totalorder %s26_s13, %s1873_s21  ;;  %p1879_p5 = scmp.lt.s32.totalorder %s1873_s21, %s1873_s21 }
   0xb   :  { %p1880_p6 = por %p1879_p5, %p1878_p4 }
   0xd   :  { %p1881_p7 = pnand %p1880_p6, %p1874_p3 }
   0xf   :  { %1884 = shalt.err (!%p1881_p7)
}
  0x10   :  { %s1934_s22 = smov 128   ;;  %s1935_s23 = smov 8  }
  0x11   :  { %31 = dma.hbm_to_vmem [thread:$0]  %s2132_s1, 20864, %s26_s13, [#allocation5], %s1934_s22, %s1934_s22, %s1935_s23  }
  0x12   :  { %s1936_s26 = smov [#allocation2]   ;;  %s1937_s28 = smov [#allocation6]  }
  0x13   :  { %s16_s27 = sshll.u32 %s1936_s26, 4  ;;  %s37_s29 = sshll.u32 %s1937_s28, 4  ;;  %s17_s27 = int_to_ptr.vmem [resolvable:$true] %s16_s27  ;;  %s38_s29 = int_to_ptr.vmem [resolvable:$true] %s37_s29 }
  0x14   :  { %s1885_s5 = scalar_lea.hbm %s2131_s0, 128 }
  0x15   :  { %p1886_p8 = scmp.ne.s32.totalorder %s2131_s0, %s1885_s5  ;;  %p1889_p9 = scmp.lt.u32.totalorder %s1885_s5, %s2131_s0 }
  0x17   :  { %p1891_p10 = pnand %p1889_p9, %p1886_p8 }
  0x19   :  { %1894 = shalt.err (!%p1891_p10)
}
  0x1a   :  { %s1895_s1 = scalar_lea.vmem %s17_s27, 128  ;;  %p1900_p12 = scmp.lt.s32.totalorder %s17_s27, %s17_s27 }
  0x1b   :  { %p1896_p11 = scmp.ne.s32.totalorder %s17_s27, %s1895_s1  ;;  %p1901_p13 = scmp.lt.s32.totalorder %s1895_s1, %s1895_s1 }
  0x1d   :  { %p1902_p0 = por %p1901_p13, %p1900_p12 }
  0x1f   :  { %p1903_p1 = pnand %p1902_p0, %p1896_p11 }
  0x21   :  { %1906 = shalt.err (!%p1903_p1)
}
  0x22   :  { %19 = dma.hbm_to_vmem [thread:$0]  %s2131_s0, 128, %s17_s27, [#allocation3]  }
  0x23   :  { %s1907_s14 = scalar_lea.hbm %s2133_s2, 256 }
  0x24   :  { %p1908_p2 = scmp.ne.s32.totalorder %s2133_s2, %s1907_s14  ;;  %p1911_p3 = scmp.lt.u32.totalorder %s1907_s14, %s2133_s2 }
  0x26   :  { %p1913_p4 = pnand %p1911_p3, %p1908_p2 }
  0x28   :  { %1916 = shalt.err (!%p1913_p4)
}
  0x29   :  { %s1917_s19 = scalar_lea.vmem %s38_s29, 256  ;;  %p1922_p6 = scmp.lt.s32.totalorder %s38_s29, %s38_s29 }
  0x2a   :  { %p1918_p5 = scmp.ne.s32.totalorder %s38_s29, %s1917_s19  ;;  %p1923_p7 = scmp.lt.s32.totalorder %s1917_s19, %s1917_s19 }
  0x2c   :  { %p1924_p8 = por %p1923_p7, %p1922_p6 }
  0x2e   :  { %p1925_p9 = pnand %p1924_p8, %p1918_p5 }
  0x30   :  { %1928 = shalt.err (!%p1925_p9)
}
  0x31   :  { %43 = dma.hbm_to_vmem [thread:$0]  %s2133_s2, 256, %s38_s29, [#allocation5], %s1934_s22, %s1934_s22, %s1935_s23  }
  0x32   :  { %1929 = dma.done.wait [#allocation3], 128  }
  0x33   :  { %1930 = vsyncadd [#allocation3], 4294967168 }
  0x34   :  { %1931 = dma.done.wait [#allocation5], 21120  }
  0x35   :  { %1932 = vsyncadd [#allocation5], 4294946176  ;;  %v1938_v0 = vmov 0.0|0.0   ;;  %vm1939_vm0 = vmmov 0   ;;  %v1940_v1 = vmov 0.0   ;;  %v54_v2 = vld [vmem:[#allocation4] sm:$0xff] }
  0x36   :  { %1612 = vmatprep.subr.bf16.mxu0 %v1938_v0  ;;  %1259 = vmatprep.mubr.msk.f32.mxu0 %vm1939_vm0, %v1940_v1  ;;  %v55_v3 = vld [vmem:[#allocation4 + $0x8] sm:$0xff]  ;;  %v137_v5 = vld [vmem:[#allocation4 + $0x18] sm:$0xff]  ;;  %v138_v6 = vld [vmem:[#allocation4 + $0x20] sm:$0xff]  ;;  %vm62_vm1 = vcmask 195584  }
  0x37   :  { %1615 = vmatprep.subr.bf16.mxu1 %v1938_v0  ;;  %1294 = vmatprep.mubr.msk.f32.mxu1 %vm1939_vm0, %v1940_v1  ;;  %v1613_v4 = vpack.c.bf16 %v55_v3, %v54_v2  ;;  %v1616_v7 = vpack.c.bf16 %v138_v6, %v137_v5  ;;  %v139_v8 = vld [vmem:[#allocation4 + $0x28] sm:$0xff]  ;;  %v140_v9 = vld [vmem:[#allocation4 + $0x30] sm:$0xff]  ;;  %v53_v12 = vld [vmem:[#allocation2] sm:$0xff] }
  0x38   :  { %v56_v10 = vld [vmem:[#allocation4 + $0x10] sm:$0xff]  ;;  %v1619_v11 = vpack.c.bf16 %v140_v9, %v139_v8  ;;  %v141_v13 = vld [vmem:[#allocation4 + $0x38] sm:$0xff]  ;;  %v142_v14 = vld [vmem:[#allocation4 + $0x40] sm:$0xff] }
  0x39   :  { %1614 = vmatpush3.bf16.msra.mxu0 %v1613_v4  ;;  %1617 = vmatpush3.bf16.msra.mxu1 %v1616_v7  ;;  %v1622_v15 = vpack.c.bf16 %v142_v14, %v141_v13  ;;  %v143_v16 = vld [vmem:[#allocation4 + $0x48] sm:$0xff]  ;;  %v144_v17 = vld [vmem:[#allocation4 + $0x50] sm:$0xff]  ;;  %v145_v19 = vld [vmem:[#allocation4 + $0x58] sm:$0xff] }
  0x3a   :  { %1257 = vmatprep.subr.mxu0 %v1940_v1  ;;  %1618 = vmatprep.subr.bf16.mxu1 %v1938_v0  ;;  %v1625_v18 = vpack.c.bf16 %v144_v17, %v143_v16  ;;  %v146_v20 = vld [vmem:[#allocation4 + $0x60] sm:$0xff]  ;;  %v147_v22 = vld [vmem:[#allocation4 + $0x68] sm:$0xff]  ;;  %v148_v23 = vld [vmem:[#allocation4 + $0x70] sm:$0xff] }
  0x3b   :  { %v1628_v21 = vpack.c.bf16 %v146_v20, %v145_v19  ;;  %v1631_v24 = vpack.c.bf16 %v148_v23, %v147_v22  ;;  %v149_v25 = vld [vmem:[#allocation4 + $0x78] sm:$0xff]  ;;  %v150_v26 = vld [vmem:[#allocation4 + $0x80] sm:$0xff]  ;;  %v151_v28 = vld [vmem:[#allocation4 + $0x88] sm:$0xff] }
  0x3c   :  { %v1634_v27 = vpack.c.bf16 %v150_v26, %v149_v25  ;;  %v152_v29 = vld [vmem:[#allocation4 + $0x90] sm:$0xff]  ;;  %v229_v31 = vld [vmem:[#allocation4 + $0x98] sm:$0xff]  ;;  %v230_v32 = vld [vmem:[#allocation4 + $0xa0] sm:$0xff] }
  0x3d   :  { %1258 = vmatpush3.msra.mxu0 %v56_v10  ;;  %1620 = vmatpush3.bf16.msra.mxu1 %v1619_v11  ;;  %v1637_v30 = vpack.c.bf16 %v152_v29, %v151_v28  ;;  %v231_v33 = vld [vmem:[#allocation4 + $0xa8] sm:$0xff]  ;;  %v1640_v34 = vpack.c.bf16 %v230_v32, %v229_v31  ;;  %v232_v35 = vld [vmem:[#allocation4 + $0xb0] sm:$0xff]  ;;  %v233_v37 = vld [vmem:[#allocation4 + $0xb8] sm:$0xff] }
  0x3e   :  { %1260 = vmatmul.mubr.msk.f32.vlgmr.msra.gmra.mrb[0].mxu0 %vm62_vm1, %v53_v12  ;;  %1621 = vmatprep.subr.bf16.mxu1 %v1938_v0  ;;  %v1643_v36 = vpack.c.bf16 %v232_v35, %v231_v33  ;;  %v234_v38 = vld [vmem:[#allocation4 + $0xc0] sm:$0xff]  ;;  %v235_v40 = vld [vmem:[#allocation4 + $0xc8] sm:$0xff]  ;;  %v236_v41 = vld [vmem:[#allocation4 + $0xd0] sm:$0xff] }
  0x3f   :  { %1639 = vmatprep.subr.bf16.mxu0 %v1938_v0  ;;  %1329 = vmatprep.mubr.msk.f32.mxu0 %vm1939_vm0, %v1940_v1  ;;  %v1646_v39 = vpack.c.bf16 %v234_v38, %v233_v37  ;;  %v1649_v42 = vpack.c.bf16 %v236_v41, %v235_v40  ;;  %v237_v43 = vld [vmem:[#allocation4 + $0xd8] sm:$0xff]  ;;  %v238_v44 = vld [vmem:[#allocation4 + $0xe0] sm:$0xff]  ;;  %v239_v46 = vld [vmem:[#allocation4 + $0xe8] sm:$0xff] }
  0x40   :  { %1641 = vmatpush3.bf16.msra.mxu0 %v1640_v34  ;;  %v1652_v45 = vpack.c.bf16 %v238_v44, %v237_v43  ;;  %v240_v47 = vld [vmem:[#allocation4 + $0xf0] sm:$0xff]  ;;  %v241_v49 = vld [vmem:[#allocation4 + $0xf8] sm:$0xff]  ;;  %v242_v50 = vld [vmem:[#allocation4 + $0x100] sm:$0xff] }
  0x41   :  { %1623 = vmatpush3.bf16.msra.mxu1 %v1622_v15  ;;  %1642 = vmatprep.subr.bf16.mxu0 %v1938_v0  ;;  %v1655_v48 = vpack.c.bf16 %v240_v47, %v239_v46  ;;  %v1658_v51 = vpack.c.bf16 %v242_v50, %v241_v49  ;;  %v1067_v52 = vld [vmem:[#allocation6] ss:$0 sm:$0xff]  ;;  %v243_v57 = vld [vmem:[#allocation4 + $0x108] sm:$0xff]  ;;  %v244_v58 = vld [vmem:[#allocation4 + $0x110] sm:$0xff] }
  0x42   :  { %1624 = vmatprep.subr.bf16.mxu1 %v1938_v0  ;;  %v1661_v59 = vpack.c.bf16 %v244_v58, %v243_v57  ;;  %v321_v60 = vld [vmem:[#allocation4 + $0x298] sm:$0xff]  ;;  %v322_v61 = vld [vmem:[#allocation4 + $0x2a0] sm:$0xff]  ;;  %v323_v62 = vld [vmem:[#allocation4 + $0x2a8] sm:$0xff] }
  0x43   :  { %v1664_v63 = vpack.c.bf16 %v322_v61, %v321_v60  ;;  %v324_v2 = vld [vmem:[#allocation4 + $0x2b0] sm:$0xff]  ;;  %v325_v4 = vld [vmem:[#allocation4 + $0x2b8] sm:$0xff]  ;;  %v326_v5 = vld [vmem:[#allocation4 + $0x2c0] sm:$0xff] }
  0x44   :  { %1644 = vmatpush3.bf16.msra.mxu0 %v1643_v36  ;;  %v1667_v3 = vpack.c.bf16 %v324_v2, %v323_v62  ;;  %v1670_v6 = vpack.c.bf16 %v326_v5, %v325_v4  ;;  %v327_v7 = vld [vmem:[#allocation4 + $0x2c8] sm:$0xff]  ;;  %v328_v8 = vld [vmem:[#allocation4 + $0x2d0] sm:$0xff]  ;;  %v329_v10 = vld [vmem:[#allocation4 + $0x2d8] sm:$0xff] }
  0x45   :  { %1626 = vmatpush3.bf16.msra.mxu1 %v1625_v18  ;;  %1645 = vmatprep.subr.bf16.mxu0 %v1938_v0  ;;  %v1673_v9 = vpack.c.bf16 %v328_v8, %v327_v7  ;;  %v330_v11 = vld [vmem:[#allocation4 + $0x2e0] sm:$0xff]  ;;  %v331_v13 = vld [vmem:[#allocation4 + $0x2e8] sm:$0xff]  ;;  %v332_v14 = vld [vmem:[#allocation4 + $0x2f0] sm:$0xff] }
  0x46   :  { %1627 = vmatprep.subr.bf16.mxu1 %v1938_v0  ;;  %v1676_v12 = vpack.c.bf16 %v330_v11, %v329_v10  ;;  %v1679_v15 = vpack.c.bf16 %v332_v14, %v331_v13  ;;  %v333_v16 = vld [vmem:[#allocation4 + $0x2f8] sm:$0xff]  ;;  %v334_v17 = vld [vmem:[#allocation4 + $0x300] sm:$0xff]  ;;  %v336_v25 = vld [vmem:[#allocation4 + $0x310] sm:$0xff] }
  0x47   :  { %v1682_v18 = vpack.c.bf16 %v334_v17, %v333_v16  ;;  %v1069_v19 = vld [vmem:[#allocation6 + $0x1] ss:$0 sm:$0xff]  ;;  %v415_v28 = vld [vmem:[#allocation4 + $0x120] sm:$0xff]  ;;  %v416_v29 = vld [vmem:[#allocation4 + $0x128] sm:$0xff] }
  0x48   :  { %1647 = vmatpush3.bf16.msra.mxu0 %v1646_v39  ;;  %v417_v31 = vld [vmem:[#allocation4 + $0x130] sm:$0xff]  ;;  %v418_v33 = vld [vmem:[#allocation4 + $0x138] sm:$0xff]  ;;  %v419_v34 = vld [vmem:[#allocation4 + $0x140] sm:$0xff] }
  0x49   :  { %1629 = vmatpush3.bf16.msra.mxu1 %v1628_v21  ;;  %1648 = vmatprep.subr.bf16.mxu0 %v1938_v0  ;;  %v1691_v32 = vpack.c.bf16 %v417_v31, %v416_v29  ;;  %v1694_v35 = vpack.c.bf16 %v419_v34, %v418_v33  ;;  %v420_v36 = vld [vmem:[#allocation4 + $0x148] sm:$0xff]  ;;  %v421_v37 = vld [vmem:[#allocation4 + $0x150] sm:$0xff]  ;;  %v422_v39 = vld [vmem:[#allocation4 + $0x158] sm:$0xff] }
  0x4a   :  { %1630 = vmatprep.subr.bf16.mxu1 %v1938_v0  ;;  %v1697_v38 = vpack.c.bf16 %v421_v37, %v420_v36  ;;  %v423_v40 = vld [vmem:[#allocation4 + $0x160] sm:$0xff]  ;;  %v425_v43 = vld [vmem:[#allocation4 + $0x170] sm:$0xff]  ;;  %v426_v50 = vld [vmem:[#allocation4 + $0x178] sm:$0xff] }
  0x4b   :  { %v1700_v41 = vpack.c.bf16 %v423_v40, %v422_v39  ;;  %v507_v57 = vld [vmem:[#allocation4 + $0x320] sm:$0xff]  ;;  %v508_v58 = vld [vmem:[#allocation4 + $0x328] sm:$0xff]  ;;  %v509_v60 = vld [vmem:[#allocation4 + $0x330] sm:$0xff] }
  0x4c   :  { %1650 = vmatpush3.bf16.msra.mxu0 %v1649_v42  ;;  %v424_v42 = vld [vmem:[#allocation4 + $0x168] sm:$0xff]  ;;  %v1715_v61 = vpack.c.bf16 %v509_v60, %v508_v58  ;;  %v510_v62 = vld [vmem:[#allocation4 + $0x338] sm:$0xff]  ;;  %v513_v4 = vld [vmem:[#allocation4 + $0x350] sm:$0xff] }
  0x4d   :  { %1632 = vmatpush3.bf16.msra.mxu1 %v1631_v24  ;;  %1651 = vmatprep.subr.bf16.mxu0 %v1938_v0  ;;  %v335_v24 = vld [vmem:[#allocation4 + $0x308] sm:$0xff]  ;;  %v1703_v44 = vpack.c.bf16 %v425_v43, %v424_v42  ;;  %v515_v7 = vld [vmem:[#allocation4 + $0x360] sm:$0xff]  ;;  %v517_v10 = vld [vmem:[#allocation4 + $0x370] sm:$0xff] }
  0x4e   :  { %1633 = vmatprep.subr.bf16.mxu1 %v1938_v0  ;;  %v1685_v26 = vpack.c.bf16 %v336_v25, %v335_v24  ;;  %v519_v13 = vld [vmem:[#allocation4 + $0x380] sm:$0xff]  ;;  %v521_v24 = vld [vmem:[#allocation4 + $0x390] sm:$0xff]  ;;  %v605_v33 = vld [vmem:[#allocation4 + $0x1c8] sm:$0xff] }
  0x4f   :  { %v604_v31 = vld [vmem:[#allocation4 + $0x1c0] sm:$0xff]  ;;  %v606_v34 = vld [vmem:[#allocation4 + $0x1d0] sm:$0xff]  ;;  %v607_v36 = vld [vmem:[#allocation4 + $0x1d8] sm:$0xff] }
  0x50   :  { %1653 = vmatpush3.bf16.msra.mxu0 %v1652_v45  ;;  %v1070_v45 = vld [vmem:[#allocation6 + $0x2] ss:$0 sm:$0xff]  ;;  %v608_v37 = vld [vmem:[#allocation4 + $0x1e0] sm:$0xff]  ;;  %v609_v39 = vld [vmem:[#allocation4 + $0x1e8] sm:$0xff] }
  0x51   :  { %1635 = vmatpush3.bf16.msra.mxu1 %v1634_v27  ;;  %1654 = vmatprep.subr.bf16.mxu0 %v1938_v0  ;;  %v414_v27 = vld [vmem:[#allocation4 + $0x118] sm:$0xff]  ;;  %v610_v40 = vld [vmem:[#allocation4 + $0x1f0] sm:$0xff]  ;;  %v696_v60 = vld [vmem:[#allocation4 + $0x3c0] sm:$0xff] }
  0x52   :  { %1636 = vmatprep.subr.bf16.mxu1 %v1938_v0  ;;  %v1072_v42 = vld [vmem:[#allocation6 + $0x3] ss:$0 sm:$0xff] }
  0x54   :  { %1656 = vmatpush3.bf16.msra.mxu0 %v1655_v48 }
  0x55   :  { %1638 = vmatpush3.bf16.msra.mxu1 %v1637_v30  ;;  %1657 = vmatprep.subr.bf16.mxu0 %v1938_v0  ;;  %v1688_v30 = vpack.c.bf16 %v415_v28, %v414_v27  ;;  %v600_v27 = vld [vmem:[#allocation4 + $0x1a0] sm:$0xff]  ;;  %v601_v28 = vld [vmem:[#allocation4 + $0x1a8] sm:$0xff] }
  0x56   :  { %1663 = vmatprep.subr.bf16.mxu1 %v1938_v0 }
  0x58   :  { %1659 = vmatpush3.bf16.msra.mxu0 %v1658_v51  ;;  %v427_v51 = vld [vmem:[#allocation4 + $0x180] sm:$0xff] }
  0x59   :  { %1660 = vmatprep.subr.bf16.mxu0 %v1938_v0 }
  0x5c   :  { %1662 = vmatpush3.bf16.msra.mxu0 %v1661_v59 }
  0x5d   :  { %1687 = vmatprep.subr.bf16.mxu0 %v1938_v0 }
 0x111   :  { %v132_v53 = vpop.f32.mrb[0].mxu0 }
 0x112   :  { %v133_v54 = vadd.f32 %v1067_v52, %v132_v53  ;;  %v1261_v55 = vpop.f32.mrb[1].mxu0  ;;  %v1706_v52 = vpack.c.bf16 %v427_v51, %v426_v50  ;;  %v428_v53 = vld [vmem:[#allocation4 + $0x188] sm:$0xff]  ;;  %v614_v51 = vld [vmem:[#allocation4 + $0x210] sm:$0xff] }
 0x113   :  { %v613_v50 = vld [vmem:[#allocation4 + $0x208] sm:$0xff] }
 0x114   :  { %v136_v56 = vmax.f32 %v133_v54, 0.0  ;;  %v429_v54 = vld [vmem:[#allocation4 + $0x190] sm:$0xff] }
 0x115   :  { %v1709_v55 = vpack.c.bf16 %v429_v54, %v428_v53  ;;  %v691_v53 = vld [vmem:[#allocation4 + $0x398] sm:$0xff]  ;;  %v692_v54 = vld [vmem:[#allocation4 + $0x3a0] sm:$0xff] }
 0x116   :  { %1295 = vmatmul.mubr.f32.vlgmr.msra.gmra.mrb[0].mxu1 %v136_v56  ;;  %v506_v56 = vld [vmem:[#allocation4 + $0x318] sm:$0xff] }
 0x117   :  { %1364 = vmatprep.mubr.msk.f32.mxu1 %vm1939_vm0, %v1940_v1  ;;  %1665 = vmatpush3.bf16.msra.mxu1 %v1664_v63  ;;  %v1712_v59 = vpack.c.bf16 %v507_v57, %v506_v56  ;;  %v511_v63 = vld [vmem:[#allocation4 + $0x340] sm:$0xff]  ;;  %v1760_v56 = vpack.c.bf16 %v692_v54, %v691_v53  ;;  %v694_v57 = vld [vmem:[#allocation4 + $0x3b0] sm:$0xff] }
 0x118   :  { %1666 = vmatprep.subr.bf16.mxu1 %v1938_v0  ;;  %v1718_v2 = vpack.c.bf16 %v511_v63, %v510_v62  ;;  %v697_v62 = vld [vmem:[#allocation4 + $0x3c8] sm:$0xff]  ;;  %v698_v63 = vld [vmem:[#allocation4 + $0x3d0] sm:$0xff] }
 0x119   :  { %v879_v54 = vld [vmem:[#allocation4 + $0x430] sm:$0xff] }
 0x11b   :  { %1668 = vmatpush3.bf16.msra.mxu1 %v1667_v3  ;;  %v512_v3 = vld [vmem:[#allocation4 + $0x348] sm:$0xff] }
 0x11c   :  { %1669 = vmatprep.subr.bf16.mxu1 %v1938_v0  ;;  %v1721_v5 = vpack.c.bf16 %v513_v4, %v512_v3  ;;  %v699_v3 = vld [vmem:[#allocation4 + $0x3d8] sm:$0xff]  ;;  %v700_v4 = vld [vmem:[#allocation4 + $0x3e0] sm:$0xff] }
 0x11f   :  { %1671 = vmatpush3.bf16.msra.mxu1 %v1670_v6  ;;  %v514_v6 = vld [vmem:[#allocation4 + $0x358] sm:$0xff] }
 0x120   :  { %1672 = vmatprep.subr.bf16.mxu1 %v1938_v0  ;;  %v1724_v8 = vpack.c.bf16 %v515_v7, %v514_v6  ;;  %v701_v6 = vld [vmem:[#allocation4 + $0x3e8] sm:$0xff]  ;;  %v702_v7 = vld [vmem:[#allocation4 + $0x3f0] sm:$0xff] }
 0x123   :  { %1674 = vmatpush3.bf16.msra.mxu1 %v1673_v9  ;;  %v516_v9 = vld [vmem:[#allocation4 + $0x368] sm:$0xff] }
 0x124   :  { %1675 = vmatprep.subr.bf16.mxu1 %v1938_v0  ;;  %v1727_v11 = vpack.c.bf16 %v517_v10, %v516_v9  ;;  %v703_v9 = vld [vmem:[#allocation4 + $0x3f8] sm:$0xff]  ;;  %v704_v10 = vld [vmem:[#allocation4 + $0x400] sm:$0xff] }
 0x127   :  { %1677 = vmatpush3.bf16.msra.mxu1 %v1676_v12  ;;  %v518_v12 = vld [vmem:[#allocation4 + $0x378] sm:$0xff] }
 0x128   :  { %1678 = vmatprep.subr.bf16.mxu1 %v1938_v0  ;;  %v1730_v14 = vpack.c.bf16 %v519_v13, %v518_v12  ;;  %v1073_v12 = vld [vmem:[#allocation6 + $0x7] ss:$0 sm:$0xff] }
 0x12b   :  { %1680 = vmatpush3.bf16.msra.mxu1 %v1679_v15  ;;  %v1071_v15 = vld [vmem:[#allocation6 + $0x6] ss:$0 sm:$0xff] }
 0x12c   :  { %1681 = vmatprep.subr.bf16.mxu1 %v1938_v0 }
 0x12f   :  { %1683 = vmatpush3.bf16.msra.mxu1 %v1682_v18 }
 0x130   :  { %1684 = vmatprep.subr.bf16.mxu1 %v1938_v0 }
 0x133   :  { %1686 = vmatpush3.bf16.msra.mxu1 %v1685_v26  ;;  %v599_v26 = vld [vmem:[#allocation4 + $0x198] sm:$0xff] }
 0x134   :  { %1711 = vmatprep.subr.bf16.mxu1 %v1938_v0 }
 0x1e9   :  { %v224_v20 = vpop.f32.mrb[0].mxu1 }
 0x1ea   :  { %v2038_v21 = vadd.f32 %v1069_v19, %v224_v20  ;;  %v1296_v22 = vpop.f32.mrb[1].mxu1 }
 0x1eb   :  { %v520_v22 = vld [vmem:[#allocation4 + $0x388] sm:$0xff] }
 0x1ec   :  { %v228_v23 = vmax.f32 %v2038_v21, 0.0  ;;  %v1733_v25 = vpack.c.bf16 %v521_v24, %v520_v22  ;;  %v1736_v21 = vpack.c.bf16 %v600_v27, %v599_v26  ;;  %v706_v22 = vld [vmem:[#allocation4 + $0x410] sm:$0xff]  ;;  %v785_v26 = vld [vmem:[#allocation4 + $0x220] sm:$0xff]  ;;  %v786_v27 = vld [vmem:[#allocation4 + $0x228] sm:$0xff] }
 0x1ee   :  { %1330 = vmatmul.mubr.f32.vlgmr.msra.gmra.mrb[2].mxu0 %v228_v23 }
 0x1ef   :  { %1399 = vmatprep.mubr.msk.f32.mxu0 %vm1939_vm0, %v1940_v1  ;;  %1689 = vmatpush3.bf16.msra.mxu0 %v1688_v30  ;;  %v603_v30 = vld [vmem:[#allocation4 + $0x1b8] sm:$0xff] }
 0x1f0   :  { %1690 = vmatprep.subr.bf16.mxu0 %v1938_v0 }
 0x1f3   :  { %1692 = vmatpush3.bf16.msra.mxu0 %v1691_v32  ;;  %v1742_v32 = vpack.c.bf16 %v604_v31, %v603_v30  ;;  %v790_v30 = vld [vmem:[#allocation4 + $0x248] sm:$0xff]  ;;  %v791_v31 = vld [vmem:[#allocation4 + $0x250] sm:$0xff] }
 0x1f4   :  { %1693 = vmatprep.subr.bf16.mxu0 %v1938_v0 }
 0x1f7   :  { %1695 = vmatpush3.bf16.msra.mxu0 %v1694_v35  ;;  %v1745_v35 = vpack.c.bf16 %v606_v34, %v605_v33  ;;  %v792_v33 = vld [vmem:[#allocation4 + $0x258] sm:$0xff]  ;;  %v793_v34 = vld [vmem:[#allocation4 + $0x260] sm:$0xff] }
 0x1f8   :  { %1696 = vmatprep.subr.bf16.mxu0 %v1938_v0 }
 0x1fb   :  { %1698 = vmatpush3.bf16.msra.mxu0 %v1697_v38  ;;  %v1748_v38 = vpack.c.bf16 %v608_v37, %v607_v36  ;;  %v794_v36 = vld [vmem:[#allocation4 + $0x268] sm:$0xff]  ;;  %v795_v37 = vld [vmem:[#allocation4 + $0x270] sm:$0xff] }
 0x1fc   :  { %1699 = vmatprep.subr.bf16.mxu0 %v1938_v0 }
 0x1ff   :  { %1701 = vmatpush3.bf16.msra.mxu0 %v1700_v41  ;;  %v1751_v41 = vpack.c.bf16 %v610_v40, %v609_v39  ;;  %v1074_v39 = vld [vmem:[#allocation6 + $0x4] ss:$0 sm:$0xff] }
 0x200   :  { %1702 = vmatprep.subr.bf16.mxu0 %v1938_v0 }
 0x203   :  { %1704 = vmatpush3.bf16.msra.mxu0 %v1703_v44 }
 0x204   :  { %1705 = vmatprep.subr.bf16.mxu0 %v1938_v0 }
 0x207   :  { %1707 = vmatpush3.bf16.msra.mxu0 %v1706_v52  ;;  %v1757_v52 = vpack.c.bf16 %v614_v51, %v613_v50  ;;  %v876_v50 = vld [vmem:[#allocation4 + $0x418] sm:$0xff]  ;;  %v877_v51 = vld [vmem:[#allocation4 + $0x420] sm:$0xff] }
 0x208   :  { %1708 = vmatprep.subr.bf16.mxu0 %v1938_v0  ;;  %v1808_v53 = vpack.c.bf16 %v877_v51, %v876_v50 }
 0x20b   :  { %1710 = vmatpush3.bf16.msra.mxu0 %v1709_v55  ;;  %v693_v55 = vld [vmem:[#allocation4 + $0x3a8] sm:$0xff] }
 0x20c   :  { %1735 = vmatprep.subr.bf16.mxu0 %v1938_v0  ;;  %v1763_v58 = vpack.c.bf16 %v694_v57, %v693_v55  ;;  %v881_v57 = vld [vmem:[#allocation4 + $0x440] sm:$0xff] }
 0x2c1   :  { %v316_v46 = vpop.f32.mrb[2].mxu0 }
 0x2c2   :  { %v317_v47 = vadd.f32 %v1070_v45, %v316_v46  ;;  %v1331_v48 = vpop.f32.mrb[3].mxu0 }
 0x2c3   :  { %v612_v48 = vld [vmem:[#allocation4 + $0x200] sm:$0xff] }
 0x2c4   :  { %v320_v49 = vmax.f32 %v317_v47, 0.0  ;;  %v611_v47 = vld [vmem:[#allocation4 + $0x1f8] sm:$0xff] }
 0x2c6   :  { %1365 = vmatmul.mubr.f32.vlgmr.msra.gmra.mrb[2].mxu1 %v320_v49  ;;  %v1754_v49 = vpack.c.bf16 %v612_v48, %v611_v47  ;;  %v798_v47 = vld [vmem:[#allocation4 + $0x288] sm:$0xff]  ;;  %v799_v48 = vld [vmem:[#allocation4 + $0x290] sm:$0xff] }
 0x2c7   :  { %1434 = vmatprep.mubr.msk.f32.mxu1 %vm1939_vm0, %v1940_v1  ;;  %1713 = vmatpush3.bf16.msra.mxu1 %v1712_v59  ;;  %v695_v59 = vld [vmem:[#allocation4 + $0x3b8] sm:$0xff] }
 0x2c8   :  { %1714 = vmatprep.subr.bf16.mxu1 %v1938_v0 }
 0x2cb   :  { %1716 = vmatpush3.bf16.msra.mxu1 %v1715_v61  ;;  %v1766_v61 = vpack.c.bf16 %v696_v60, %v695_v59  ;;  %v882_v59 = vld [vmem:[#allocation4 + $0x448] sm:$0xff]  ;;  %v883_v60 = vld [vmem:[#allocation4 + $0x450] sm:$0xff] }
 0x2cc   :  { %1717 = vmatprep.subr.bf16.mxu1 %v1938_v0 }
 0x2cf   :  { %1719 = vmatpush3.bf16.msra.mxu1 %v1718_v2  ;;  %v1769_v2 = vpack.c.bf16 %v698_v63, %v697_v62  ;;  %v884_v62 = vld [vmem:[#allocation4 + $0x458] sm:$0xff]  ;;  %v885_v63 = vld [vmem:[#allocation4 + $0x460] sm:$0xff] }
 0x2d0   :  { %1720 = vmatprep.subr.bf16.mxu1 %v1938_v0 }
 0x2d3   :  { %1722 = vmatpush3.bf16.msra.mxu1 %v1721_v5  ;;  %v1772_v5 = vpack.c.bf16 %v700_v4, %v699_v3  ;;  %v886_v3 = vld [vmem:[#allocation4 + $0x468] sm:$0xff]  ;;  %v887_v4 = vld [vmem:[#allocation4 + $0x470] sm:$0xff] }
 0x2d4   :  { %1723 = vmatprep.subr.bf16.mxu1 %v1938_v0 }
 0x2d7   :  { %1725 = vmatpush3.bf16.msra.mxu1 %v1724_v8  ;;  %v1775_v8 = vpack.c.bf16 %v702_v7, %v701_v6  ;;  %v888_v6 = vld [vmem:[#allocation4 + $0x478] sm:$0xff]  ;;  %v889_v7 = vld [vmem:[#allocation4 + $0x480] sm:$0xff] }
 0x2d8   :  { %1726 = vmatprep.subr.bf16.mxu1 %v1938_v0 }
 0x2db   :  { %1728 = vmatpush3.bf16.msra.mxu1 %v1727_v11  ;;  %v1778_v11 = vpack.c.bf16 %v704_v10, %v703_v9  ;;  %v1075_v9 = vld [vmem:[#allocation6 + $0x8] ss:$0 sm:$0xff] }
 0x2dc   :  { %1729 = vmatprep.subr.bf16.mxu1 %v1938_v0 }
 0x2df   :  { %1731 = vmatpush3.bf16.msra.mxu1 %v1730_v14 }
 0x2e0   :  { %1732 = vmatprep.subr.bf16.mxu1 %v1938_v0 }
 0x2e3   :  { %1734 = vmatpush3.bf16.msra.mxu1 %v1733_v25  ;;  %v784_v25 = vld [vmem:[#allocation4 + $0x218] sm:$0xff] }
 0x2e4   :  { %1759 = vmatprep.subr.bf16.mxu1 %v1938_v0 }
 0x399   :  { %v408_v16 = vpop.f32.mrb[2].mxu1 }
 0x39a   :  { %v409_v17 = vadd.f32 %v1071_v15, %v408_v16  ;;  %v1366_v18 = vpop.f32.mrb[3].mxu1 }
 0x39b   :  { %v705_v18 = vld [vmem:[#allocation4 + $0x408] sm:$0xff] }
 0x39c   :  { %v2065_v19 = vadd.f32 %v409_v17, %v228_v23  ;;  %v602_v23 = vld [vmem:[#allocation4 + $0x1b0] sm:$0xff]  ;;  %v1781_v24 = vpack.c.bf16 %v706_v22, %v705_v18 }
 0x39d   :  { %v1739_v29 = vpack.c.bf16 %v602_v23, %v601_v28  ;;  %v789_v23 = vld [vmem:[#allocation4 + $0x240] sm:$0xff]  ;;  %v891_v18 = vld [vmem:[#allocation4 + $0x490] sm:$0xff] }
 0x39e   :  { %v413_v20 = vmax.f32 %v2065_v19, 0.0  ;;  %v1784_v19 = vpack.c.bf16 %v785_v26, %v784_v25  ;;  %v970_v25 = vld [vmem:[#allocation4 + $0x4a0] sm:$0xff]  ;;  %v971_v26 = vld [vmem:[#allocation4 + $0x4a8] sm:$0xff] }
 0x3a0   :  { %1400 = vmatmul.mubr.f32.vlgmr.msra.gmra.mrb[4].mxu0 %v413_v20 }
 0x3a1   :  { %1469 = vmatprep.mubr.msk.f32.mxu0 %vm1939_vm0, %v1940_v1  ;;  %1737 = vmatpush3.bf16.msra.mxu0 %v1736_v21  ;;  %v788_v21 = vld [vmem:[#allocation4 + $0x238] sm:$0xff] }
 0x3a2   :  { %1738 = vmatprep.subr.bf16.mxu0 %v1938_v0 }
 0x3a5   :  { %1740 = vmatpush3.bf16.msra.mxu0 %v1739_v29  ;;  %v1790_v29 = vpack.c.bf16 %v789_v23, %v788_v21  ;;  %v976_v21 = vld [vmem:[#allocation4 + $0x4d0] sm:$0xff] }
 0x3a6   :  { %1741 = vmatprep.subr.bf16.mxu0 %v1938_v0 }
 0x3a9   :  { %1743 = vmatpush3.bf16.msra.mxu0 %v1742_v32  ;;  %v1793_v32 = vpack.c.bf16 %v791_v31, %v790_v30  ;;  %v978_v30 = vld [vmem:[#allocation4 + $0x4e0] sm:$0xff] }
 0x3aa   :  { %1744 = vmatprep.subr.bf16.mxu0 %v1938_v0 }
 0x3ad   :  { %1746 = vmatpush3.bf16.msra.mxu0 %v1745_v35  ;;  %v1796_v35 = vpack.c.bf16 %v793_v34, %v792_v33  ;;  %v980_v33 = vld [vmem:[#allocation4 + $0x4f0] sm:$0xff] }
 0x3ae   :  { %1747 = vmatprep.subr.bf16.mxu0 %v1938_v0 }
 0x3b1   :  { %1749 = vmatpush3.bf16.msra.mxu0 %v1748_v38  ;;  %v1799_v38 = vpack.c.bf16 %v795_v37, %v794_v36 }
 0x3b2   :  { %1750 = vmatprep.subr.bf16.mxu0 %v1938_v0 }
 0x3b5   :  { %1752 = vmatpush3.bf16.msra.mxu0 %v1751_v41 }
 0x3b6   :  { %1753 = vmatprep.subr.bf16.mxu0 %v1938_v0 }
 0x3b9   :  { %1755 = vmatpush3.bf16.msra.mxu0 %v1754_v49  ;;  %v1805_v49 = vpack.c.bf16 %v799_v48, %v798_v47 }
 0x3ba   :  { %1756 = vmatprep.subr.bf16.mxu0 %v1938_v0 }
 0x3bd   :  { %1758 = vmatpush3.bf16.msra.mxu0 %v1757_v52  ;;  %v878_v52 = vld [vmem:[#allocation4 + $0x428] sm:$0xff] }
 0x3be   :  { %1783 = vmatprep.subr.bf16.mxu0 %v1938_v0  ;;  %v1811_v55 = vpack.c.bf16 %v879_v54, %v878_v52  ;;  %v1078_v52 = vld [vmem:[#allocation6 + $0xa] ss:$0 sm:$0xff] }
 0x473   :  { %v501_v43 = vpop.f32.mrb[4].mxu0 }
 0x474   :  { %v502_v44 = vadd.f32 %v1072_v42, %v501_v43  ;;  %v1401_v45 = vpop.f32.mrb[5].mxu0 }
 0x475   :  { %v797_v45 = vld [vmem:[#allocation4 + $0x280] sm:$0xff] }
 0x476   :  { %v505_v46 = vmax.f32 %v502_v44, 0.0  ;;  %v796_v44 = vld [vmem:[#allocation4 + $0x278] sm:$0xff] }
 0x478   :  { %1435 = vmatmul.mubr.f32.vlgmr.msra.gmra.mrb[4].mxu1 %v505_v46  ;;  %v1802_v46 = vpack.c.bf16 %v797_v45, %v796_v44  ;;  %v984_v44 = vld [vmem:[#allocation4 + $0x510] sm:$0xff] }
 0x479   :  { %1504 = vmatprep.mubr.msk.f32.mxu1 %vm1939_vm0, %v1940_v1  ;;  %1761 = vmatpush3.bf16.msra.mxu1 %v1760_v56  ;;  %v880_v56 = vld [vmem:[#allocation4 + $0x438] sm:$0xff] }
 0x47a   :  { %1762 = vmatprep.subr.bf16.mxu1 %v1938_v0 }
 0x47d   :  { %1764 = vmatpush3.bf16.msra.mxu1 %v1763_v58  ;;  %v1814_v58 = vpack.c.bf16 %v881_v57, %v880_v56 }
 0x47e   :  { %1765 = vmatprep.subr.bf16.mxu1 %v1938_v0 }
 0x481   :  { %1767 = vmatpush3.bf16.msra.mxu1 %v1766_v61  ;;  %v1817_v61 = vpack.c.bf16 %v883_v60, %v882_v59 }
 0x482   :  { %1768 = vmatprep.subr.bf16.mxu1 %v1938_v0 }
 0x485   :  { %1770 = vmatpush3.bf16.msra.mxu1 %v1769_v2  ;;  %v1820_v2 = vpack.c.bf16 %v885_v63, %v884_v62 }
 0x486   :  { %1771 = vmatprep.subr.bf16.mxu1 %v1938_v0 }
 0x489   :  { %1773 = vmatpush3.bf16.msra.mxu1 %v1772_v5  ;;  %v1823_v5 = vpack.c.bf16 %v887_v4, %v886_v3 }
 0x48a   :  { %1774 = vmatprep.subr.bf16.mxu1 %v1938_v0 }
 0x48d   :  { %1776 = vmatpush3.bf16.msra.mxu1 %v1775_v8  ;;  %v1826_v8 = vpack.c.bf16 %v889_v7, %v888_v6 }
 0x48e   :  { %1777 = vmatprep.subr.bf16.mxu1 %v1938_v0 }
 0x491   :  { %1779 = vmatpush3.bf16.msra.mxu1 %v1778_v11 }
 0x492   :  { %1780 = vmatprep.subr.bf16.mxu1 %v1938_v0 }
 0x495   :  { %1782 = vmatpush3.bf16.msra.mxu1 %v1781_v24  ;;  %v969_v24 = vld [vmem:[#allocation4 + $0x498] sm:$0xff] }
 0x496   :  { %1807 = vmatprep.subr.bf16.mxu1 %v1938_v0 }
 0x54b   :  { %v593_v13 = vpop.f32.mrb[4].mxu1 }
 0x54c   :  { %v594_v14 = vadd.f32 %v1073_v12, %v593_v13  ;;  %v1436_v15 = vpop.f32.mrb[5].mxu1 }
 0x54d   :  { %v890_v15 = vld [vmem:[#allocation4 + $0x488] sm:$0xff] }
 0x54e   :  { %v2092_v16 = vadd.f32 %v594_v14, %v413_v20  ;;  %v787_v20 = vld [vmem:[#allocation4 + $0x230] sm:$0xff]  ;;  %v1829_v22 = vpack.c.bf16 %v891_v18, %v890_v15 }
 0x54f   :  { %v1787_v28 = vpack.c.bf16 %v787_v20, %v786_v27  ;;  %v1832_v27 = vpack.c.bf16 %v970_v25, %v969_v24 }
 0x550   :  { %v598_v17 = vmax.f32 %v2092_v16, 0.0  ;;  %v973_v16 = vld [vmem:[#allocation4 + $0x4b8] sm:$0xff] }
 0x552   :  { %1470 = vmatmul.mubr.f32.vlgmr.msra.gmra.mrb[6].mxu0 %v598_v17 }
 0x553   :  { %1539 = vmatprep.mubr.msk.f32.mxu0 %vm1939_vm0, %v1940_v1  ;;  %1785 = vmatpush3.bf16.msra.mxu0 %v1784_v19  ;;  %v972_v19 = vld [vmem:[#allocation4 + $0x4b0] sm:$0xff] }
 0x554   :  { %1786 = vmatprep.subr.bf16.mxu0 %v1938_v0  ;;  %v1835_v20 = vpack.c.bf16 %v972_v19, %v971_v26 }
 0x557   :  { %1788 = vmatpush3.bf16.msra.mxu0 %v1787_v28 }
 0x558   :  { %1789 = vmatprep.subr.bf16.mxu0 %v1938_v0 }
 0x55b   :  { %1791 = vmatpush3.bf16.msra.mxu0 %v1790_v29  ;;  %v977_v29 = vld [vmem:[#allocation4 + $0x4d8] sm:$0xff] }
 0x55c   :  { %1792 = vmatprep.subr.bf16.mxu0 %v1938_v0  ;;  %v1844_v31 = vpack.c.bf16 %v978_v30, %v977_v29 }
 0x55f   :  { %1794 = vmatpush3.bf16.msra.mxu0 %v1793_v32  ;;  %v979_v32 = vld [vmem:[#allocation4 + $0x4e8] sm:$0xff] }
 0x560   :  { %1795 = vmatprep.subr.bf16.mxu0 %v1938_v0  ;;  %v1847_v34 = vpack.c.bf16 %v980_v33, %v979_v32 }
 0x563   :  { %1797 = vmatpush3.bf16.msra.mxu0 %v1796_v35  ;;  %v1076_v35 = vld [vmem:[#allocation6 + $0x5] ss:$0 sm:$0xff] }
 0x564   :  { %1798 = vmatprep.subr.bf16.mxu0 %v1938_v0 }
 0x567   :  { %1800 = vmatpush3.bf16.msra.mxu0 %v1799_v38 }
 0x568   :  { %1801 = vmatprep.subr.bf16.mxu0 %v1938_v0 }
 0x56b   :  { %1803 = vmatpush3.bf16.msra.mxu0 %v1802_v46  ;;  %v1077_v46 = vld [vmem:[#allocation6 + $0x9] ss:$0 sm:$0xff] }
 0x56c   :  { %1804 = vmatprep.subr.bf16.mxu0 %v1938_v0 }
 0x56f   :  { %1806 = vmatpush3.bf16.msra.mxu0 %v1805_v49 }
 0x570   :  { %1831 = vmatprep.subr.bf16.mxu0 %v1938_v0 }
 0x625   :  { %v686_v40 = vpop.f32.mrb[6].mxu0 }
 0x626   :  { %v687_v41 = vadd.f32 %v1074_v39, %v686_v40  ;;  %v1471_v42 = vpop.f32.mrb[7].mxu0  ;;  %v981_v40 = vld [vmem:[#allocation4 + $0x4f8] sm:$0xff] }
 0x628   :  { %v690_v43 = vmax.f32 %v687_v41, 0.0  ;;  %v982_v41 = vld [vmem:[#allocation4 + $0x500] sm:$0xff] }
 0x629   :  { %v1850_v42 = vpack.c.bf16 %v982_v41, %v981_v40 }
 0x62a   :  { %1505 = vmatmul.mubr.f32.vlgmr.msra.gmra.mrb[6].mxu1 %v690_v43  ;;  %v983_v43 = vld [vmem:[#allocation4 + $0x508] sm:$0xff] }
 0x62b   :  { %1574 = vmatprep.mubr.msk.f32.mxu1 %vm1939_vm0, %v1940_v1  ;;  %1809 = vmatpush3.bf16.msra.mxu1 %v1808_v53  ;;  %v1853_v45 = vpack.c.bf16 %v984_v44, %v983_v43 }
 0x62c   :  { %1810 = vmatprep.subr.bf16.mxu1 %v1938_v0 }
 0x62f   :  { %1812 = vmatpush3.bf16.msra.mxu1 %v1811_v55 }
 0x630   :  { %1813 = vmatprep.subr.bf16.mxu1 %v1938_v0 }
 0x633   :  { %1815 = vmatpush3.bf16.msra.mxu1 %v1814_v58 }
 0x634   :  { %1816 = vmatprep.subr.bf16.mxu1 %v1938_v0 }
 0x637   :  { %1818 = vmatpush3.bf16.msra.mxu1 %v1817_v61 }
 0x638   :  { %1819 = vmatprep.subr.bf16.mxu1 %v1938_v0 }
 0x63b   :  { %1821 = vmatpush3.bf16.msra.mxu1 %v1820_v2 }
 0x63c   :  { %1822 = vmatprep.subr.bf16.mxu1 %v1938_v0 }
 0x63f   :  { %1824 = vmatpush3.bf16.msra.mxu1 %v1823_v5 }
 0x640   :  { %1825 = vmatprep.subr.bf16.mxu1 %v1938_v0 }
 0x643   :  { %1827 = vmatpush3.bf16.msra.mxu1 %v1826_v8 }
 0x644   :  { %1828 = vmatprep.subr.bf16.mxu1 %v1938_v0 }
 0x647   :  { %1830 = vmatpush3.bf16.msra.mxu1 %v1829_v22 }
 0x6fd   :  { %v778_v10 = vpop.f32.mrb[6].mxu1 }
 0x6fe   :  { %v779_v11 = vadd.f32 %v1075_v9, %v778_v10  ;;  %v1506_v12 = vpop.f32.mrb[7].mxu1 }
 0x700   :  { %v782_v13 = vadd.f32 %v779_v11, %v598_v17  ;;  %v974_v17 = vld [vmem:[#allocation4 + $0x4c0] sm:$0xff] }
 0x701   :  { %v1838_v28 = vpack.c.bf16 %v974_v17, %v973_v16 }
 0x702   :  { %v783_v14 = vmax.f32 %v782_v13, 0.0 }
 0x704   :  { %1540 = vmatmul.mubr.f32.vlgmr.msra.gmra.mrb[8].mxu0 %v783_v14 }
 0x705   :  { %1609 = vmatprep.mubr.msk.f32.mxu0 %vm1939_vm0, %v1940_v1  ;;  %1833 = vmatpush3.bf16.msra.mxu0 %v1832_v27  ;;  %v975_v1 = vld [vmem:[#allocation4 + $0x4c8] sm:$0xff] }
 0x706   :  { %1834 = vmatprep.subr.bf16.mxu0 %v1938_v0  ;;  %v1841_v23 = vpack.c.bf16 %v976_v21, %v975_v1 }
 0x709   :  { %1836 = vmatpush3.bf16.msra.mxu0 %v1835_v20 }
 0x70a   :  { %1837 = vmatprep.subr.bf16.mxu0 %v1938_v0 }
 0x70d   :  { %1839 = vmatpush3.bf16.msra.mxu0 %v1838_v28 }
 0x70e   :  { %1840 = vmatprep.subr.bf16.mxu0 %v1938_v0 }
 0x711   :  { %1842 = vmatpush3.bf16.msra.mxu0 %v1841_v23 }
 0x712   :  { %1843 = vmatprep.subr.bf16.mxu0 %v1938_v0 }
 0x715   :  { %1845 = vmatpush3.bf16.msra.mxu0 %v1844_v31 }
 0x716   :  { %1846 = vmatprep.subr.bf16.mxu0 %v1938_v0 }
 0x719   :  { %1848 = vmatpush3.bf16.msra.mxu0 %v1847_v34 }
 0x71a   :  { %1849 = vmatprep.subr.bf16.mxu0 %v1938_v0 }
 0x71d   :  { %1851 = vmatpush3.bf16.msra.mxu0 %v1850_v42 }
 0x71e   :  { %1852 = vmatprep.subr.bf16.mxu0 %v1938_v0 }
 0x721   :  { %1854 = vmatpush3.bf16.msra.mxu0 %v1853_v45 }
 0x7d7   :  { %v871_v36 = vpop.f32.mrb[8].mxu0 }
 0x7d8   :  { %v872_v37 = vadd.f32 %v1076_v35, %v871_v36  ;;  %v1541_v38 = vpop.f32.mrb[9].mxu0 }
 0x7da   :  { %v875_v39 = vmax.f32 %v872_v37, 0.0 }
 0x7dc   :  { %1575 = vmatmul.mubr.f32.vlgmr.msra.gmra.mrb[8].mxu1 %v875_v39 }
 0x8af   :  { %v963_v47 = vpop.f32.mrb[8].mxu1 }
 0x8b0   :  { %v964_v48 = vadd.f32 %v1077_v46, %v963_v47  ;;  %v1576_v49 = vpop.f32.mrb[9].mxu1 }
 0x8b2   :  { %v967_v50 = vadd.f32 %v964_v48, %v783_v14 }
 0x8b4   :  { %v968_v51 = vmax.f32 %v967_v50, 0.0 }
 0x8b6   :  { %1610 = vmatmul.mubr.f32.vlgmr.msra.gmra.mrb[10].mxu0 %v968_v51 }
 0x989   :  { %v1056_v53 = vpop.f32.mrb[10].mxu0 }
 0x98a   :  { %v1057_v54 = vadd.f32 %v1078_v52, %v1056_v53  ;;  %v1611_v55 = vpop.f32.mrb[11].mxu0 }
 0x98c   :  { %1060 = vst [vmem:[%s2134_s3] sm:$0xff] %v1057_v54 }
 0x98d   :  { %1065 = vsyncpa [#allocation3], 1 }
 0x98e   :  { %1066 = vsyncpa [#allocation5], 1 }

</bundles_post_ra>
